<compile_context>
chip_gen: v7x
topology: tpu7x:2x2x1
jax: 0.10.0
libtpu: 0.0.40
codegen_flags: <defaults>
</compile_context>

<pallas_src>
import functools
import math

import jax
import jax.numpy as jnp
import numpy as np
from jax import lax
from jax.experimental import pallas as pl
from jax.experimental.pallas import tpu as pltpu

LN_EPS = 1e-5     # torch.nn.LayerNorm default
NEG_INF = -1e30   # finite "minus infinity" for masking


def _choose_seq_tile(S, target=256):
    """Largest divisor of S that is a multiple of 8 and <= target, else S."""
    if S <= target:
        return S
    for t in range(min(target, S), 7, -1):
        if S % t == 0 and t % 8 == 0:
            return t
    return S


# ----------------------------------------------------------------------------
# Kernel 1: fused multi-head attention + W_out + residual + LayerNorm
# ----------------------------------------------------------------------------
def _attn_block_kernel(q_ref, kv_ref, wq_ref, wk_ref, wv_ref, wo_ref, bo_ref,
                       g_ref, bt_ref, o_ref, *, num_heads, dk, dv, causal, scale):
    q = q_ref[0]                                                       # (Tq, D)
    kv = kv_ref[0]                                                     # (Skv, D)
    Tq = q.shape[0]
    Skv = kv.shape[0]

    # Whole-row projections for all heads at once (lane-dense N = H*dk).
    # 1/sqrt(dk) folded into Q: touches Tq*H*dk elements instead of Tq*Skv/head.
    # TODO(synk): cast matmul operands to bf16 (f32 accumulation) on v6e/v7x.
    Q = jnp.dot(q, wq_ref[...], preferred_element_type=jnp.float32) * scale
    K = jnp.dot(kv, wk_ref[...], preferred_element_type=jnp.float32)
    V = jnp.dot(kv, wv_ref[...], preferred_element_type=jnp.float32)

    # Hoisted causal mask: iotas/compare computed once, reused by every head.
    if causal:
        row0 = pl.program_id(1) * Tq
        row = lax.broadcasted_iota(jnp.int32, (Tq, Skv), 0) + row0
        col = lax.broadcasted_iota(jnp.int32, (Tq, Skv), 1)
        mask_add = jnp.where(col > row, jnp.float32(NEG_INF), jnp.float32(0.0))

    # TODO(synk): flash-style Skv tiling (online softmax, 'arbitrary' grid axis)
    # so the (Tq, Skv) f32 score matrix never exceeds VMEM at long sequences.
    ctx_parts = []
    for h in range(num_heads):
        Qh = Q[:, h * dk:(h + 1) * dk]
        Kh = K[:, h * dk:(h + 1) * dk]
        Vh = V[:, h * dv:(h + 1) * dv]
        s = jnp.dot(Qh, Kh.T, preferred_element_type=jnp.float32)      # (Tq, Skv)
        if causal:
            s = s + mask_add
        s = s - jnp.max(s, axis=-1, keepdims=True)
        p = jnp.exp(s)
        # Exact division (not approx reciprocal): keeps the end-to-end error
        # inside tolerance; this divide is not on the critical path.
        p = p / jnp.sum(p, axis=-1, keepdims=True)
        ctx_parts.append(jnp.dot(p, Vh, preferred_element_type=jnp.float32))
    ctx = jnp.concatenate(ctx_parts, axis=-1)                          # (Tq, H*dv)

    # W_out projection + residual (dropout = identity) + LayerNorm, fused.
    y = jnp.dot(ctx, wo_ref[...], preferred_element_type=jnp.float32) + bo_ref[...]
    y = y + q
    mu = jnp.mean(y, axis=-1, keepdims=True)
    var = jnp.mean((y - mu) * (y - mu), axis=-1, keepdims=True)        # two-pass
    yn = (y - mu) * lax.rsqrt(var + LN_EPS)
    o_ref[...] = (yn * g_ref[...] + bt_ref[...]).reshape(o_ref.shape)


def attention_block(q_in, kv_in, Wq, Wk, Wv, Wout, bout, gamma, beta,
                    *, num_heads, causal):
    """Fused MHA + W_out + residual + LayerNorm.  Residual is q_in.

    Wq/Wk: (D, H*dk) stacked per-head weights; Wv: (D, H*dv); Wout: (H*dv, D).
    Returns (B, Sq, D) float32.
    """
    B, Sq, D = q_in.shape
    _, Skv, _ = kv_in.shape
    dk = Wq.shape[-1] // num_heads
    dv = Wv.shape[-1] // num_heads
    tq = _choose_seq_tile(Sq)
    n_q = Sq // tq

    kernel = functools.partial(_attn_block_kernel, num_heads=num_heads, dk=dk,
                               dv=dv, causal=causal, scale=1.0 / math.sqrt(dk))
    return pl.pallas_call(
        kernel,
        out_shape=jax.ShapeDtypeStruct((B, Sq, D), jnp.float32),
        grid=(B, n_q),
        in_specs=[
            pl.BlockSpec((1, tq, D), lambda b, i: (b, i, 0)),          # q / residual
            pl.BlockSpec((1, Skv, D), lambda b, i: (b, 0, 0)),         # kv
            pl.BlockSpec((D, num_heads * dk), lambda b, i: (0, 0)),    # Wq (stacked)
            pl.BlockSpec((D, num_heads * dk), lambda b, i: (0, 0)),    # Wk (stacked)
            pl.BlockSpec((D, num_heads * dv), lambda b, i: (0, 0)),    # Wv (stacked)
            pl.BlockSpec((num_heads * dv, D), lambda b, i: (0, 0)),    # W_out
            pl.BlockSpec((1, D), lambda b, i: (0, 0)),                 # b_out
            pl.BlockSpec((1, D), lambda b, i: (0, 0)),                 # LN gamma
            pl.BlockSpec((1, D), lambda b, i: (0, 0)),                 # LN beta
        ],
        out_specs=pl.BlockSpec((1, tq, D), lambda b, i: (b, i, 0)),    # lane-dense
        compiler_params=pltpu.CompilerParams(
            dimension_semantics=("parallel", "parallel")),
    )(q_in, kv_in, Wq, Wk, Wv, Wout, bout, gamma, beta)


# ----------------------------------------------------------------------------
# Kernel 2: fused FeedForward + residual + LayerNorm
# ----------------------------------------------------------------------------
def _ffn_block_kernel(x_ref, w1_ref, b1_ref, w2_ref, b2_ref, g_ref, bt_ref, o_ref):
    x = x_ref[0]                                                       # (Ts, D)
    # TODO(synk): tile the expansion axis E as a trailing 'arbitrary' reduction
    # grid axis with a VMEM accumulator for production dims (v7x 64 MiB VMEM).
    h = jnp.dot(x, w1_ref[...], preferred_element_type=jnp.float32) + b1_ref[...]
    h = jnp.maximum(h, 0.0)                                            # ReLU
    y = jnp.dot(h, w2_ref[...], preferred_element_type=jnp.float32) + b2_ref[...]
    y = y + x                                                          # residual
    mu = jnp.mean(y, axis=-1, keepdims=True)
    var = jnp.mean((y - mu) * (y - mu), axis=-1, keepdims=True)        # two-pass
    yn = (y - mu) * lax.rsqrt(var + LN_EPS)
    o_ref[...] = (yn * g_ref[...] + bt_ref[...]).reshape(o_ref.shape)


def ffn_block(x, W1, b1, W2, b2, gamma, beta):
    B, S, D = x.shape
    E = W1.shape[-1]
    ts = _choose_seq_tile(S)
    n_s = S // ts
    return pl.pallas_call(
        _ffn_block_kernel,
        out_shape=jax.ShapeDtypeStruct((B, S, D), jnp.float32),
        grid=(B, n_s),
        in_specs=[
            pl.BlockSpec((1, ts, D), lambda b, i: (b, i, 0)),
            pl.BlockSpec((D, E), lambda b, i: (0, 0)),
            pl.BlockSpec((1, E), lambda b, i: (0, 0)),
            pl.BlockSpec((E, D), lambda b, i: (0, 0)),
            pl.BlockSpec((1, D), lambda b, i: (0, 0)),
            pl.BlockSpec((1, D), lambda b, i: (0, 0)),
            pl.BlockSpec((1, D), lambda b, i: (0, 0)),
        ],
        out_specs=pl.BlockSpec((1, ts, D), lambda b, i: (b, i, 0)),
        compiler_params=pltpu.CompilerParams(
            dimension_semantics=("parallel", "parallel")),
    )(x, W1, b1, W2, b2, gamma, beta)


# ----------------------------------------------------------------------------
# DecoderBlock forward (Pallas) + parameter init
# ----------------------------------------------------------------------------
def init_decoder_block_params(key, model_dim, num_heads, expansion_dim):
    dk = dv = model_dim // num_heads
    ks = jax.random.split(key, 12)
    s = 1.0 / math.sqrt(model_dim)

    def nrm(k, shape, scale):
        return (scale * jax.random.normal(k, shape)).astype(jnp.float32)

    return {
        # masked (self) attention — per-head weights stacked along last dim
        "self_Wq": nrm(ks[0], (model_dim, num_heads * dk), s),
        "self_Wk": nrm(ks[1], (model_dim, num_heads * dk), s),
        "self_Wv": nrm(ks[2], (model_dim, num_heads * dv), s),
        "self_Wout": nrm(ks[3], (num_heads * dv, model_dim), s),
        "self_bout": nrm(ks[4], (1, model_dim), s),
        # cross attention
        "cross_Wq": nrm(ks[5], (model_dim, num_heads * dk), s),
        "cross_Wk": nrm(ks[6], (model_dim, num_heads * dk), s),
        "cross_Wv": nrm(ks[7], (model_dim, num_heads * dv), s),
        "cross_Wout": nrm(ks[8], (num_heads * dv, model_dim), s),
        "cross_bout": nrm(ks[9], (1, model_dim), s),
        # feed forward
        "ff_W1": nrm(ks[10], (model_dim, expansion_dim), s),
        "ff_b1": jnp.zeros((1, expansion_dim), jnp.float32),
        "ff_W2": nrm(ks[11], (expansion_dim, model_dim), 1.0 / math.sqrt(expansion_dim)),
        "ff_b2": jnp.zeros((1, model_dim), jnp.float32),
        # layer norms (affine)
        "ln1_g": jnp.ones((1, model_dim), jnp.float32),
        "ln1_b": jnp.zeros((1, model_dim), jnp.float32),
        "ln2_g": jnp.ones((1, model_dim), jnp.float32),
        "ln2_b": jnp.zeros((1, model_dim), jnp.float32),
        "ln3_g": jnp.ones((1, model_dim), jnp.float32),
        "ln3_b": jnp.zeros((1, model_dim), jnp.float32),
    }


def decoder_block_forward(params, decoder_input, encoder_output, *, num_heads):
    # 1) masked multi-head self-attention + W_out + residual + LN1 (one kernel)
    x = attention_block(decoder_input, decoder_input,
                        params["self_Wq"], params["self_Wk"], params["self_Wv"],
                        params["self_Wout"], params["self_bout"],
                        params["ln1_g"], params["ln1_b"],
                        num_heads=num_heads, causal=True)
    # 2) cross attention over encoder output + W_out + residual + LN2 (one kernel)
    x = attention_block(x, encoder_output,
                        params["cross_Wq"], params["cross_Wk"], params["cross_Wv"],
                        params["cross_Wout"], params["cross_bout"],
                        params["ln2_g"], params["ln2_b"],
                        num_heads=num_heads, causal=False)
    # 3) feed forward + residual + LN3 (one kernel)
    x = ffn_block(x, params["ff_W1"], params["ff_b1"],
                  params["ff_W2"], params["ff_b2"],
                  params["ln3_g"], params["ln3_b"])
    return x


# ----------------------------------------------------------------------------
# Pure-JAX reference (mirrors the PyTorch forward, eval mode)
# ----------------------------------------------------------------------------
def _ref_forward(params, dec_in, enc_out, num_heads):
    D = dec_in.shape[-1]
    dk = dv = D // num_heads

    def mha(q, kv, Wq, Wk, Wv, Wout, bout, causal):
        Q = q @ Wq
        K = kv @ Wk
        V = kv @ Wv
        outs = []
        for h in range(num_heads):
            Qh = Q[..., h * dk:(h + 1) * dk]
            Kh = K[..., h * dk:(h + 1) * dk]
            Vh = V[..., h * dv:(h + 1) * dv]
            s = jnp.einsum("bqd,bkd->bqk", Qh, Kh) / math.sqrt(dk)
            if causal:
                Sq, Skv = s.shape[-2:]
                mask = jnp.triu(jnp.ones((Sq, Skv), bool), k=1)
                s = jnp.where(mask, -jnp.inf, s)
            p = jax.nn.softmax(s, axis=-1)
            outs.append(jnp.einsum("bqk,bkd->bqd", p, Vh))
        return jnp.concatenate(outs, -1) @ Wout + bout[0]

    def ln(x, g, b):
        mu = x.mean(-1, keepdims=True)
        var = ((x - mu) ** 2).mean(-1, keepdims=True)
        return (x - mu) / jnp.sqrt(var + LN_EPS) * g[0] + b[0]

    x = ln(mha(dec_in, dec_in, params["self_Wq"], params["self_Wk"],
               params["self_Wv"], params["self_Wout"], params["self_bout"],
               True) + dec_in, params["ln1_g"], params["ln1_b"])
    x = ln(mha(x, enc_out, params["cross_Wq"], params["cross_Wk"],
               params["cross_Wv"], params["cross_Wout"], params["cross_bout"],
               False) + x, params["ln2_g"], params["ln2_b"])
    h = jnp.maximum(x @ params["ff_W1"] + params["ff_b1"][0], 0.0)
    y = h @ params["ff_W2"] + params["ff_b2"][0] + x
    return ln(y, params["ln3_g"], params["ln3_b"])


if __name__ == "__main__":
    model_dim, num_heads, expansion_dim = 32, 4, 64
    batch, dec_seq, enc_seq = 2, 8, 16

    key = jax.random.PRNGKey(0)
    k_p, k_d, k_e = jax.random.split(key, 3)
    params = init_decoder_block_params(k_p, model_dim, num_heads, expansion_dim)
    decoder_input = jax.random.normal(k_d, (batch, dec_seq, model_dim), jnp.float32)
    encoder_output = jax.random.normal(k_e, (batch, enc_seq, model_dim), jnp.float32)

    out = decoder_block_forward(params, decoder_input, encoder_output,
                                num_heads=num_heads)
    out = jax.block_until_ready(out)

    ref = _ref_forward(params, decoder_input, encoder_output, num_heads)
    np.testing.assert_allclose(np.asarray(out), np.asarray(ref),
                               atol=1e-3, rtol=1e-3)

    print("KERNEL_OK")
</pallas_src>

<mosaic_0001>
module attributes {stable_mosaic.version = 11 : i64} {
  func.func @_attn_block_kernel(%arg0: i32, %arg1: i32, %arg2: memref<1x8x32xf32, #tpu.memory_space<vmem>>, %arg3: memref<1x8x32xf32, #tpu.memory_space<vmem>>, %arg4: memref<32x32xf32, #tpu.memory_space<vmem>>, %arg5: memref<32x32xf32, #tpu.memory_space<vmem>>, %arg6: memref<32x32xf32, #tpu.memory_space<vmem>>, %arg7: memref<32x32xf32, #tpu.memory_space<vmem>>, %arg8: memref<1x32xf32, #tpu.memory_space<vmem>>, %arg9: memref<1x32xf32, #tpu.memory_space<vmem>>, %arg10: memref<1x32xf32, #tpu.memory_space<vmem>>, %arg11: memref<1x8x32xf32, #tpu.memory_space<vmem>>) attributes {dimension_semantics = [#tpu.dimension_semantics<parallel>, #tpu.dimension_semantics<parallel>], iteration_bounds = array<i64: 2, 1>, scalar_prefetch = 0 : i64, scratch_operands = 0 : i64, tpu.core_type = #tpu.core_type<tc>, window_params = [{transform_indices = @transform_0, window_bounds = array<i64: 1, 8, 32>}, {transform_indices = @transform_1, window_bounds = array<i64: 1, 8, 32>}, {pipeline_mode = #tpu.pipeline_mode<synchronous>, transform_indices = @transform_2, window_bounds = array<i64: 32, 32>}, {pipeline_mode = #tpu.pipeline_mode<synchronous>, transform_indices = @transform_3, window_bounds = array<i64: 32, 32>}, {pipeline_mode = #tpu.pipeline_mode<synchronous>, transform_indices = @transform_4, window_bounds = array<i64: 32, 32>}, {pipeline_mode = #tpu.pipeline_mode<synchronous>, transform_indices = @transform_5, window_bounds = array<i64: 32, 32>}, {pipeline_mode = #tpu.pipeline_mode<synchronous>, transform_indices = @transform_6, window_bounds = array<i64: 1, 32>}, {pipeline_mode = #tpu.pipeline_mode<synchronous>, transform_indices = @transform_7, window_bounds = array<i64: 1, 32>}, {pipeline_mode = #tpu.pipeline_mode<synchronous>, transform_indices = @transform_8, window_bounds = array<i64: 1, 32>}, {transform_indices = @transform_9, window_bounds = array<i64: 1, 8, 32>}]} {
    %c0 = arith.constant 0 : index
    %c0_0 = arith.constant 0 : index
    %c0_1 = arith.constant 0 : index
    %0 = vector.load %arg2[%c0, %c0_0, %c0_1] : memref<1x8x32xf32, #tpu.memory_space<vmem>>, vector<1x8x32xf32>
    %1 = vector.shape_cast %0 : vector<1x8x32xf32> to vector<8x32xf32>
    %c0_2 = arith.constant 0 : index
    %c0_3 = arith.constant 0 : index
    %c0_4 = arith.constant 0 : index
    %2 = vector.load %arg3[%c0_2, %c0_3, %c0_4] : memref<1x8x32xf32, #tpu.memory_space<vmem>>, vector<1x8x32xf32>
    %3 = vector.shape_cast %2 : vector<1x8x32xf32> to vector<8x32xf32>
    %c0_5 = arith.constant 0 : index
    %c0_6 = arith.constant 0 : index
    %4 = vector.load %arg4[%c0_5, %c0_6] : memref<32x32xf32, #tpu.memory_space<vmem>>, vector<32x32xf32>
    %cst = arith.constant dense<0.000000e+00> : vector<8x32xf32>
    %5 = tpu.matmul %1, %4, %cst {dimension_numbers = #tpu.dot_dimension_numbers<[1], [0], [0], [1], [0, 0, 1, 1], [], []>} : vector<8x32xf32>, vector<32x32xf32>, vector<8x32xf32> -> vector<8x32xf32>
    %cst_7 = arith.constant 0.353553385 : f32
    %6 = vector.broadcast %cst_7 : f32 to vector<8x32xf32>
    %7 = arith.mulf %5, %6 : vector<8x32xf32>
    %c0_8 = arith.constant 0 : index
    %c0_9 = arith.constant 0 : index
    %8 = vector.load %arg5[%c0_8, %c0_9] : memref<32x32xf32, #tpu.memory_space<vmem>>, vector<32x32xf32>
    %cst_10 = arith.constant dense<0.000000e+00> : vector<8x32xf32>
    %9 = tpu.matmul %3, %8, %cst_10 {dimension_numbers = #tpu.dot_dimension_numbers<[1], [0], [0], [1], [0, 0, 1, 1], [], []>} : vector<8x32xf32>, vector<32x32xf32>, vector<8x32xf32> -> vector<8x32xf32>
    %c0_11 = arith.constant 0 : index
    %c0_12 = arith.constant 0 : index
    %10 = vector.load %arg6[%c0_11, %c0_12] : memref<32x32xf32, #tpu.memory_space<vmem>>, vector<32x32xf32>
    %cst_13 = arith.constant dense<0.000000e+00> : vector<8x32xf32>
    %11 = tpu.matmul %3, %10, %cst_13 {dimension_numbers = #tpu.dot_dimension_numbers<[1], [0], [0], [1], [0, 0, 1, 1], [], []>} : vector<8x32xf32>, vector<32x32xf32>, vector<8x32xf32> -> vector<8x32xf32>
    %c8_i32 = arith.constant 8 : i32
    %12 = arith.muli %arg1, %c8_i32 : i32
    %13 = tpu.iota {dimensions = array<i32: 0>} : vector<8x8xi32>
    %14 = vector.broadcast %12 : i32 to vector<8x8xi32>
    %15 = arith.addi %13, %14 : vector<8x8xi32>
    %16 = tpu.iota {dimensions = array<i32: 1>} : vector<8x8xi32>
    %17 = arith.cmpi sgt, %16, %15 : vector<8x8xi32>
    %cst_14 = arith.constant -1.000000e+30 : f32
    %cst_15 = arith.constant 0.000000e+00 : f32
    %18 = vector.broadcast %cst_14 : f32 to vector<8x8xf32>
    %19 = vector.broadcast %cst_15 : f32 to vector<8x8xf32>
    %20 = arith.select %17, %18, %19 : vector<8x8xi1>, vector<8x8xf32>
    %21 = vector.extract_strided_slice %7 {offsets = [0, 0], sizes = [8, 8], strides = [1, 1]} : vector<8x32xf32> to vector<8x8xf32>
    %22 = vector.extract_strided_slice %9 {offsets = [0, 0], sizes = [8, 8], strides = [1, 1]} : vector<8x32xf32> to vector<8x8xf32>
    %23 = vector.extract_strided_slice %11 {offsets = [0, 0], sizes = [8, 8], strides = [1, 1]} : vector<8x32xf32> to vector<8x8xf32>
    %24 = tpu.transpose %22, [1, 0] : vector<8x8xf32> -> vector<8x8xf32>
    %cst_16 = arith.constant dense<0.000000e+00> : vector<8x8xf32>
    %25 = tpu.matmul %21, %24, %cst_16 {dimension_numbers = #tpu.dot_dimension_numbers<[1], [0], [0], [1], [0, 0, 1, 1], [], []>} : vector<8x8xf32>, vector<8x8xf32>, vector<8x8xf32> -> vector<8x8xf32>
    %26 = arith.addf %25, %20 : vector<8x8xf32>
    %cst_17 = arith.constant dense<0xFF800000> : vector<8xf32>
    %27 = vector.multi_reduction <maximumf>, %26, %cst_17 [1] : vector<8x8xf32> to vector<8xf32>
    %28 = vector.shape_cast %27 : vector<8xf32> to vector<8x1xf32>
    %29 = vector.broadcast %28 : vector<8x1xf32> to vector<8x8xf32>
    %30 = arith.subf %26, %29 : vector<8x8xf32>
    %31 = math.exp %30 : vector<8x8xf32>
    %cst_18 = arith.constant dense<0.000000e+00> : vector<8xf32>
    %32 = vector.multi_reduction <add>, %31, %cst_18 [1] : vector<8x8xf32> to vector<8xf32>
    %33 = vector.shape_cast %32 : vector<8xf32> to vector<8x1xf32>
    %34 = vector.broadcast %33 : vector<8x1xf32> to vector<8x8xf32>
    %35 = arith.divf %31, %34 : vector<8x8xf32>
    %cst_19 = arith.constant dense<0.000000e+00> : vector<8x8xf32>
    %36 = tpu.matmul %35, %23, %cst_19 {dimension_numbers = #tpu.dot_dimension_numbers<[1], [0], [0], [1], [0, 0, 1, 1], [], []>} : vector<8x8xf32>, vector<8x8xf32>, vector<8x8xf32> -> vector<8x8xf32>
    %37 = vector.extract_strided_slice %7 {offsets = [0, 8], sizes = [8, 8], strides = [1, 1]} : vector<8x32xf32> to vector<8x8xf32>
    %38 = vector.extract_strided_slice %9 {offsets = [0, 8], sizes = [8, 8], strides = [1, 1]} : vector<8x32xf32> to vector<8x8xf32>
    %39 = vector.extract_strided_slice %11 {offsets = [0, 8], sizes = [8, 8], strides = [1, 1]} : vector<8x32xf32> to vector<8x8xf32>
    %40 = tpu.transpose %38, [1, 0] : vector<8x8xf32> -> vector<8x8xf32>
    %cst_20 = arith.constant dense<0.000000e+00> : vector<8x8xf32>
    %41 = tpu.matmul %37, %40, %cst_20 {dimension_numbers = #tpu.dot_dimension_numbers<[1], [0], [0], [1], [0, 0, 1, 1], [], []>} : vector<8x8xf32>, vector<8x8xf32>, vector<8x8xf32> -> vector<8x8xf32>
    %42 = arith.addf %41, %20 : vector<8x8xf32>
    %cst_21 = arith.constant dense<0xFF800000> : vector<8xf32>
    %43 = vector.multi_reduction <maximumf>, %42, %cst_21 [1] : vector<8x8xf32> to vector<8xf32>
    %44 = vector.shape_cast %43 : vector<8xf32> to vector<8x1xf32>
    %45 = vector.broadcast %44 : vector<8x1xf32> to vector<8x8xf32>
    %46 = arith.subf %42, %45 : vector<8x8xf32>
    %47 = math.exp %46 : vector<8x8xf32>
    %cst_22 = arith.constant dense<0.000000e+00> : vector<8xf32>
    %48 = vector.multi_reduction <add>, %47, %cst_22 [1] : vector<8x8xf32> to vector<8xf32>
    %49 = vector.shape_cast %48 : vector<8xf32> to vector<8x1xf32>
    %50 = vector.broadcast %49 : vector<8x1xf32> to vector<8x8xf32>
    %51 = arith.divf %47, %50 : vector<8x8xf32>
    %cst_23 = arith.constant dense<0.000000e+00> : vector<8x8xf32>
    %52 = tpu.matmul %51, %39, %cst_23 {dimension_numbers = #tpu.dot_dimension_numbers<[1], [0], [0], [1], [0, 0, 1, 1], [], []>} : vector<8x8xf32>, vector<8x8xf32>, vector<8x8xf32> -> vector<8x8xf32>
    %53 = vector.extract_strided_slice %7 {offsets = [0, 16], sizes = [8, 8], strides = [1, 1]} : vector<8x32xf32> to vector<8x8xf32>
    %54 = vector.extract_strided_slice %9 {offsets = [0, 16], sizes = [8, 8], strides = [1, 1]} : vector<8x32xf32> to vector<8x8xf32>
    %55 = vector.extract_strided_slice %11 {offsets = [0, 16], sizes = [8, 8], strides = [1, 1]} : vector<8x32xf32> to vector<8x8xf32>
    %56 = tpu.transpose %54, [1, 0] : vector<8x8xf32> -> vector<8x8xf32>
    %cst_24 = arith.constant dense<0.000000e+00> : vector<8x8xf32>
    %57 = tpu.matmul %53, %56, %cst_24 {dimension_numbers = #tpu.dot_dimension_numbers<[1], [0], [0], [1], [0, 0, 1, 1], [], []>} : vector<8x8xf32>, vector<8x8xf32>, vector<8x8xf32> -> vector<8x8xf32>
    %58 = arith.addf %57, %20 : vector<8x8xf32>
    %cst_25 = arith.constant dense<0xFF800000> : vector<8xf32>
    %59 = vector.multi_reduction <maximumf>, %58, %cst_25 [1] : vector<8x8xf32> to vector<8xf32>
    %60 = vector.shape_cast %59 : vector<8xf32> to vector<8x1xf32>
    %61 = vector.broadcast %60 : vector<8x1xf32> to vector<8x8xf32>
    %62 = arith.subf %58, %61 : vector<8x8xf32>
    %63 = math.exp %62 : vector<8x8xf32>
    %cst_26 = arith.constant dense<0.000000e+00> : vector<8xf32>
    %64 = vector.multi_reduction <add>, %63, %cst_26 [1] : vector<8x8xf32> to vector<8xf32>
    %65 = vector.shape_cast %64 : vector<8xf32> to vector<8x1xf32>
    %66 = vector.broadcast %65 : vector<8x1xf32> to vector<8x8xf32>
    %67 = arith.divf %63, %66 : vector<8x8xf32>
    %cst_27 = arith.constant dense<0.000000e+00> : vector<8x8xf32>
    %68 = tpu.matmul %67, %55, %cst_27 {dimension_numbers = #tpu.dot_dimension_numbers<[1], [0], [0], [1], [0, 0, 1, 1], [], []>} : vector<8x8xf32>, vector<8x8xf32>, vector<8x8xf32> -> vector<8x8xf32>
    %69 = vector.extract_strided_slice %7 {offsets = [0, 24], sizes = [8, 8], strides = [1, 1]} : vector<8x32xf32> to vector<8x8xf32>
    %70 = vector.extract_strided_slice %9 {offsets = [0, 24], sizes = [8, 8], strides = [1, 1]} : vector<8x32xf32> to vector<8x8xf32>
    %71 = vector.extract_strided_slice %11 {offsets = [0, 24], sizes = [8, 8], strides = [1, 1]} : vector<8x32xf32> to vector<8x8xf32>
    %72 = tpu.transpose %70, [1, 0] : vector<8x8xf32> -> vector<8x8xf32>
    %cst_28 = arith.constant dense<0.000000e+00> : vector<8x8xf32>
    %73 = tpu.matmul %69, %72, %cst_28 {dimension_numbers = #tpu.dot_dimension_numbers<[1], [0], [0], [1], [0, 0, 1, 1], [], []>} : vector<8x8xf32>, vector<8x8xf32>, vector<8x8xf32> -> vector<8x8xf32>
    %74 = arith.addf %73, %20 : vector<8x8xf32>
    %cst_29 = arith.constant dense<0xFF800000> : vector<8xf32>
    %75 = vector.multi_reduction <maximumf>, %74, %cst_29 [1] : vector<8x8xf32> to vector<8xf32>
    %76 = vector.shape_cast %75 : vector<8xf32> to vector<8x1xf32>
    %77 = vector.broadcast %76 : vector<8x1xf32> to vector<8x8xf32>
    %78 = arith.subf %74, %77 : vector<8x8xf32>
    %79 = math.exp %78 : vector<8x8xf32>
    %cst_30 = arith.constant dense<0.000000e+00> : vector<8xf32>
    %80 = vector.multi_reduction <add>, %79, %cst_30 [1] : vector<8x8xf32> to vector<8xf32>
    %81 = vector.shape_cast %80 : vector<8xf32> to vector<8x1xf32>
    %82 = vector.broadcast %81 : vector<8x1xf32> to vector<8x8xf32>
    %83 = arith.divf %79, %82 : vector<8x8xf32>
    %cst_31 = arith.constant dense<0.000000e+00> : vector<8x8xf32>
    %84 = tpu.matmul %83, %71, %cst_31 {dimension_numbers = #tpu.dot_dimension_numbers<[1], [0], [0], [1], [0, 0, 1, 1], [], []>} : vector<8x8xf32>, vector<8x8xf32>, vector<8x8xf32> -> vector<8x8xf32>
    %85 = tpu.concatenate %36, %52, %68, %84 in 1 : vector<8x8xf32>, vector<8x8xf32>, vector<8x8xf32>, vector<8x8xf32> -> vector<8x32xf32>
    %c0_32 = arith.constant 0 : index
    %c0_33 = arith.constant 0 : index
    %86 = vector.load %arg7[%c0_32, %c0_33] : memref<32x32xf32, #tpu.memory_space<vmem>>, vector<32x32xf32>
    %cst_34 = arith.constant dense<0.000000e+00> : vector<8x32xf32>
    %87 = tpu.matmul %85, %86, %cst_34 {dimension_numbers = #tpu.dot_dimension_numbers<[1], [0], [0], [1], [0, 0, 1, 1], [], []>} : vector<8x32xf32>, vector<32x32xf32>, vector<8x32xf32> -> vector<8x32xf32>
    %c0_35 = arith.constant 0 : index
    %c0_36 = arith.constant 0 : index
    %88 = vector.load %arg8[%c0_35, %c0_36] : memref<1x32xf32, #tpu.memory_space<vmem>>, vector<1x32xf32>
    %89 = vector.broadcast %88 : vector<1x32xf32> to vector<8x32xf32>
    %90 = arith.addf %87, %89 : vector<8x32xf32>
    %91 = arith.addf %90, %1 : vector<8x32xf32>
    %cst_37 = arith.constant dense<0.000000e+00> : vector<8xf32>
    %92 = vector.multi_reduction <add>, %91, %cst_37 [1] : vector<8x32xf32> to vector<8xf32>
    %93 = vector.shape_cast %92 : vector<8xf32> to vector<8x1xf32>
    %cst_38 = arith.constant 3.200000e+01 : f32
    %94 = vector.broadcast %cst_38 : f32 to vector<8x1xf32>
    %95 = arith.divf %93, %94 : vector<8x1xf32>
    %96 = vector.broadcast %95 : vector<8x1xf32> to vector<8x32xf32>
    %97 = arith.subf %91, %96 : vector<8x32xf32>
    %98 = vector.broadcast %95 : vector<8x1xf32> to vector<8x32xf32>
    %99 = arith.subf %91, %98 : vector<8x32xf32>
    %100 = arith.mulf %97, %99 : vector<8x32xf32>
    %cst_39 = arith.constant dense<0.000000e+00> : vector<8xf32>
    %101 = vector.multi_reduction <add>, %100, %cst_39 [1] : vector<8x32xf32> to vector<8xf32>
    %102 = vector.shape_cast %101 : vector<8xf32> to vector<8x1xf32>
    %cst_40 = arith.constant 3.200000e+01 : f32
    %103 = vector.broadcast %cst_40 : f32 to vector<8x1xf32>
    %104 = arith.divf %102, %103 : vector<8x1xf32>
    %105 = vector.broadcast %95 : vector<8x1xf32> to vector<8x32xf32>
    %106 = arith.subf %91, %105 : vector<8x32xf32>
    %cst_41 = arith.constant 9.99999974E-6 : f32
    %107 = vector.broadcast %cst_41 : f32 to vector<8x1xf32>
    %108 = arith.addf %104, %107 : vector<8x1xf32>
    %109 = math.rsqrt %108 : vector<8x1xf32>
    %110 = vector.broadcast %109 : vector<8x1xf32> to vector<8x32xf32>
    %111 = arith.mulf %106, %110 : vector<8x32xf32>
    %c0_42 = arith.constant 0 : index
    %c0_43 = arith.constant 0 : index
    %112 = vector.load %arg9[%c0_42, %c0_43] : memref<1x32xf32, #tpu.memory_space<vmem>>, vector<1x32xf32>
    %113 = vector.broadcast %112 : vector<1x32xf32> to vector<8x32xf32>
    %114 = arith.mulf %111, %113 : vector<8x32xf32>
    %c0_44 = arith.constant 0 : index
    %c0_45 = arith.constant 0 : index
    %115 = vector.load %arg10[%c0_44, %c0_45] : memref<1x32xf32, #tpu.memory_space<vmem>>, vector<1x32xf32>
    %116 = vector.broadcast %115 : vector<1x32xf32> to vector<8x32xf32>
    %117 = arith.addf %114, %116 : vector<8x32xf32>
    %118 = vector.shape_cast %117 : vector<8x32xf32> to vector<1x8x32xf32>
    %c0_46 = arith.constant 0 : index
    %c0_47 = arith.constant 0 : index
    %c0_48 = arith.constant 0 : index
    %119 = vector.load %arg11[%c0_46, %c0_47, %c0_48] : memref<1x8x32xf32, #tpu.memory_space<vmem>>, vector<1x8x32xf32>
    tpu.vector_store %arg11[%c0_46, %c0_47, %c0_48], %118 {strides = array<i32>} : memref<1x8x32xf32, #tpu.memory_space<vmem>>, vector<1x8x32xf32>,
    return
  }
  func.func @transform_0(%arg0: i32, %arg1: i32) -> (i32, i32, i32) {
    %c0_i32 = arith.constant 0 : i32
    %c0_i32_0 = arith.constant 0 : i32
    return %arg0, %arg1, %c0_i32 : i32, i32, i32
  }
  func.func @transform_1(%arg0: i32, %arg1: i32) -> (i32, i32, i32) {
    %c0_i32 = arith.constant 0 : i32
    %c0_i32_0 = arith.constant 0 : i32
    %c0_i32_1 = arith.constant 0 : i32
    return %arg0, %c0_i32, %c0_i32_0 : i32, i32, i32
  }
  func.func @transform_2(%arg0: i32, %arg1: i32) -> (i32, i32) {
    %c0_i32 = arith.constant 0 : i32
    %c0_i32_0 = arith.constant 0 : i32
    %c0_i32_1 = arith.constant 0 : i32
    return %c0_i32, %c0_i32_0 : i32, i32
  }
  func.func @transform_3(%arg0: i32, %arg1: i32) -> (i32, i32) {
    %c0_i32 = arith.constant 0 : i32
    %c0_i32_0 = arith.constant 0 : i32
    %c0_i32_1 = arith.constant 0 : i32
    return %c0_i32, %c0_i32_0 : i32, i32
  }
  func.func @transform_4(%arg0: i32, %arg1: i32) -> (i32, i32) {
    %c0_i32 = arith.constant 0 : i32
    %c0_i32_0 = arith.constant 0 : i32
    %c0_i32_1 = arith.constant 0 : i32
    return %c0_i32, %c0_i32_0 : i32, i32
  }
  func.func @transform_5(%arg0: i32, %arg1: i32) -> (i32, i32) {
    %c0_i32 = arith.constant 0 : i32
    %c0_i32_0 = arith.constant 0 : i32
    %c0_i32_1 = arith.constant 0 : i32
    return %c0_i32, %c0_i32_0 : i32, i32
  }
  func.func @transform_6(%arg0: i32, %arg1: i32) -> (i32, i32) {
    %c0_i32 = arith.constant 0 : i32
    %c0_i32_0 = arith.constant 0 : i32
    %c0_i32_1 = arith.constant 0 : i32
    return %c0_i32, %c0_i32_0 : i32, i32
  }
  func.func @transform_7(%arg0: i32, %arg1: i32) -> (i32, i32) {
    %c0_i32 = arith.constant 0 : i32
    %c0_i32_0 = arith.constant 0 : i32
    %c0_i32_1 = arith.constant 0 : i32
    return %c0_i32, %c0_i32_0 : i32, i32
  }
  func.func @transform_8(%arg0: i32, %arg1: i32) -> (i32, i32) {
    %c0_i32 = arith.constant 0 : i32
    %c0_i32_0 = arith.constant 0 : i32
    %c0_i32_1 = arith.constant 0 : i32
    return %c0_i32, %c0_i32_0 : i32, i32
  }
  func.func @transform_9(%arg0: i32, %arg1: i32) -> (i32, i32, i32) {
    %c0_i32 = arith.constant 0 : i32
    %c0_i32_0 = arith.constant 0 : i32
    return %arg0, %arg1, %c0_i32 : i32, i32, i32
  }
}

</mosaic_0001>

<bundles_post_ra>
// kernel: tpu_custom_call.1
= control target key start
LH: loop header
LB: loop body
LE: loop exit
PB: predicated region body
PF: predicated region fallthrough
CT: control target
= control target key end

     0   :  { %s2761_s0 = inlined_call_operand.hbm [shape: f32[2,8,32], index: 0, kind: input, shape index: {}]   ;;  %s2762_s1 = inlined_call_operand.hbm [shape: f32[2,8,32], index: 1, kind: input, shape index: {}]   ;;  %s2763_s2 = inlined_call_operand.hbm [shape: f32[32,32], index: 2, kind: input, shape index: {}]   ;;  %s2764_s3 = inlined_call_operand.hbm [shape: f32[32,32], index: 3, kind: input, shape index: {}]   ;;  %s2765_s4 = inlined_call_operand.hbm [shape: f32[32,32], index: 4, kind: input, shape index: {}]   ;;  %s2766_s5 = inlined_call_operand.hbm [shape: f32[32,32], index: 5, kind: input, shape index: {}]   ;;  %s2767_s6 = inlined_call_operand.vmem [shape: f32[1,32], index: 6, kind: input, shape index: {}]   ;;  %s2768_s7 = inlined_call_operand.vmem [shape: f32[1,32], index: 7, kind: input, shape index: {}]   ;;  %s2769_s8 = inlined_call_operand.vmem [shape: f32[1,32], index: 8, kind: input, shape index: {}]   ;;  %s2770_s9 = inlined_call_operand.hbm [shape: f32[2,8,32], index: 9, kind: output, shape index: {}]  }
   0x1   :  { %2777 = sst [smem:[#allocation21_spill]] %s2763_s2 }
   0x2   :  { %2778 = sst [smem:[#allocation22_spill]] %s2764_s3 }
   0x3   :  { %2779 = sst [smem:[#allocation23_spill]] %s2765_s4 }
   0x4   :  { %2780 = sst [smem:[#allocation24_spill]] %s2766_s5 }
   0x5   :  { %2781 = sst [smem:[#allocation25_spill]] %s2768_s7 }
   0x6   :  { %2782 = sst [smem:[#allocation26_spill]] %s2769_s8 }
   0x7   :  { %2783 = sst [smem:[#allocation27_spill]] %s2770_s9 }
   0x8   :  { %14 = vsyncpa [#allocation3], 0 }
   0x9   :  { %16 = vsyncpa [#allocation3 + $0x1], 0 }
   0xa   :  { %17 = vsyncpa [#allocation6], 0 }
   0xb   :  { %19 = vsyncpa [#allocation6 + $0x1], 0 }
   0xc   :  { %20 = vsyncpa [#allocation9], 0 }
   0xd   :  { %21 = vsyncpa [#allocation12], 0 }
   0xe   :  { %22 = vsyncpa [#allocation4], 0 }
   0xf   :  { %24 = vsyncpa [#allocation4 + $0x1], 0  ;;  %s2311_s30 = smov 0   ;;  %s2313_s10 = smov 0  }
  0x10   :  { %s2315_s11 = smov 0   ;;  %s2317_s12 = smov 0  }
  0x11   :  { %s2319_s13 = smov 0   ;;  %s2321_s14 = smov 0  }
  0x12 LB: > { %s2342_s15 = sadd.s32 4294967295, %s2241_s14   ;;  %p1649_p0 = scmp.ge.s32.totalorder %s2241_s14, 1  ;;  %s2241_s14 = sphi %s2321_s14, %s30_s14   ;;  %s2237_s13 = sphi %s2319_s13, %s2817_s13   ;;  %s2233_s12 = sphi %s2317_s12, %s2816_s12   ;;  %s2229_s11 = sphi %s2315_s11, %s2815_s11   ;;  %s2225_s10 = sphi %s2313_s10, %s2814_s10   ;;  %s2221_s30 = sphi %s2311_s30, %s2813_s30  }
  0x13   : > { %p2772_p1 = scmp.eq.s32.totalorder %s2342_s15, 0  ;;  %p276_p2 = scmp.lt.s32.totalorder %s2241_s14, 3 }
  0x14   : > { %s2243_s17 = smov [#allocation7]   ;;  %s2244_s20 = smov [#allocation8]  }
  0x15   : > { %p2347_p3 = pnand %p1649_p0, %p276_p2  ;;  %s288_s18 = sshll.u32 %s2243_s17, 4  ;;  %s2351_s18 = int_to_ptr.vmem [resolvable:$true] %s288_s18 }
  0x16   : > { %s301_s21 = sshll.u32 %s2244_s20, 4  ;;  %s2245_s22 = smov [#allocation10]   ;;  %s2362_s21 = int_to_ptr.vmem [resolvable:$true] %s301_s21 }
  0x17   : > { %s2784_s16 = scalar_select %p2347_p3, 1, 0 }
  0x18   : > { %p1856_p4 = pneg %p2347_p3  ;;  %s2364_s23 = sshll.u32 %s2245_s22, 4  ;;  %s315_s23 = int_to_ptr.vmem [resolvable:$true] %s2364_s23 }
  0x19   : > { %s2786_s2 = sld [smem:[#allocation21_spill]] }
  0x1a   : > { %p2358_p6 = pnand %p1856_p4, %p2772_p1 }
  0x1c   : > { %p2374_p8 = pneg %p2358_p6 }
  0x1f   : > { %s1971_s26 = scalar_lea.hbm %s2786_s2, 512 }
  0x20   : > { %p1972_p7 = scmp.ne.s32.totalorder %s2786_s2, %s1971_s26  ;;  %p1978_p11 = scmp.lt.u32.totalorder %s1971_s26, %s2786_s2 }
  0x22   : > { %p1974_p9 = pnand %p2374_p8, %p1972_p7 }
  0x24   : > { %p1975_p10 = pneg %p1974_p9 }
  0x26   : > { %p1980_p12 = pnand %p1978_p11, %p1975_p10 }
  0x28   : > { %1983 = shalt.err (!%p1980_p12)
}
  0x29   : > { %s1984_s22 = scalar_lea.vmem %s2351_s18, 512  ;;  %p1992_p4 = scmp.lt.s32.totalorder %s2351_s18, %s2351_s18 }
  0x2a   : > { %p1985_p13 = scmp.ne.s32.totalorder %s2351_s18, %s1984_s22  ;;  %p1993_p5 = scmp.lt.s32.totalorder %s1984_s22, %s1984_s22 }
  0x2c   : > { %p1987_p0 = pnand %p1985_p13, %p2374_p8  ;;  %p1994_p7 = por %p1993_p5, %p1992_p4 }
  0x2e   : > { %p1988_p2 = pneg %p1987_p0 }
  0x30   : > { %p1995_p9 = pnand %p1994_p7, %p1988_p2 }
  0x32   : > { %1998 = shalt.err (!%p1995_p9)
}
  0x33   : > { %s2246_s24 = smov 128   ;;  %s2247_s25 = smov 8  }
  0x34   : > { %1859 = dma.hbm_to_vmem [thread:$0]  (!%p2358_p6), %s2786_s2, 512, %s2351_s18, [#allocation6], %s2246_s24, %s2246_s24, %s2247_s25  }
  0x35   : > { %s2788_s3 = sld [smem:[#allocation22_spill]] }
  0x3b   : > { %s1999_s20 = scalar_lea.hbm %s2788_s3, 512 }
  0x3c   : > { %p2000_p5 = scmp.ne.s32.totalorder %s2788_s3, %s1999_s20  ;;  %p2006_p12 = scmp.lt.u32.totalorder %s1999_s20, %s2788_s3 }
  0x3e   : > { %p2002_p10 = pnand %p2000_p5, %p2374_p8 }
  0x40   : > { %p2003_p11 = pneg %p2002_p10 }
  0x42   : > { %p2008_p13 = pnand %p2006_p12, %p2003_p11 }
  0x44   : > { %2011 = shalt.err (!%p2008_p13)
}
  0x45   : > { %s2012_s18 = scalar_lea.vmem %s2362_s21, 512  ;;  %p2020_p7 = scmp.lt.s32.totalorder %s2362_s21, %s2362_s21 }
  0x46   : > { %p2013_p0 = scmp.ne.s32.totalorder %s2362_s21, %s2012_s18  ;;  %p2021_p9 = scmp.lt.s32.totalorder %s2012_s18, %s2012_s18 }
  0x48   : > { %p2015_p2 = pnand %p2013_p0, %p2374_p8  ;;  %p2022_p5 = por %p2021_p9, %p2020_p7 }
  0x4a   : > { %p2016_p4 = pneg %p2015_p2 }
  0x4c   : > { %p2023_p10 = pnand %p2022_p5, %p2016_p4 }
  0x4e   : > { %2026 = shalt.err (!%p2023_p10)
}
  0x4f   : > { %1862 = dma.hbm_to_vmem [thread:$0]  (!%p2358_p6), %s2788_s3, 512, %s2362_s21, [#allocation9], %s2246_s24, %s2246_s24, %s2247_s25  }
  0x50   : > { %s2789_s4 = sld [smem:[#allocation23_spill]] }
  0x56   : > { %s2027_s27 = scalar_lea.hbm %s2789_s4, 512 }
  0x57   : > { %p2028_p11 = scmp.ne.s32.totalorder %s2789_s4, %s2027_s27  ;;  %p2034_p0 = scmp.lt.u32.totalorder %s2027_s27, %s2789_s4 }
  0x59   : > { %p2030_p12 = pnand %p2028_p11, %p2374_p8 }
  0x5b   : > { %p2031_p13 = pneg %p2030_p12 }
  0x5d   : > { %p2036_p2 = pnand %p2034_p0, %p2031_p13 }
  0x5f   : > { %2039 = shalt.err (!%p2036_p2)
}
  0x60   : > { %s2040_s18 = scalar_lea.vmem %s315_s23, 512  ;;  %p2048_p5 = scmp.lt.s32.totalorder %s315_s23, %s315_s23 }
  0x61   : > { %p2041_p4 = scmp.ne.s32.totalorder %s315_s23, %s2040_s18  ;;  %p2049_p10 = scmp.lt.s32.totalorder %s2040_s18, %s2040_s18 }
  0x63   : > { %p2043_p7 = pnand %p2041_p4, %p2374_p8  ;;  %p2050_p1 = por %p2049_p10, %p2048_p5 }
  0x65   : > { %p2044_p9 = pneg %p2043_p7 }
  0x67   : > { %p2051_p3 = pnand %p2050_p1, %p2044_p9 }
  0x69   : > { %2054 = shalt.err (!%p2051_p3)
}
  0x6a   : > { %1865 = dma.hbm_to_vmem [thread:$0]  (!%p2358_p6), %s2789_s4, 512, %s315_s23, [#allocation9], %s2246_s24, %s2246_s24, %s2247_s25  }
  0x6b   : > { %s2248_s8 = smov [#allocation11]   ;;  %s2790_s5 = sld [smem:[#allocation24_spill]] }
  0x6c   : > { %s327_s9 = sshll.u32 %s2248_s8, 4  ;;  %s328_s9 = int_to_ptr.vmem [resolvable:$true] %s327_s9 }
  0x71   : > { %s2055_s28 = scalar_lea.hbm %s2790_s5, 512 }
  0x72   : > { %p2056_p1 = scmp.ne.s32.totalorder %s2790_s5, %s2055_s28  ;;  %p2062_p12 = scmp.lt.u32.totalorder %s2055_s28, %s2790_s5 }
  0x74   : > { %p2058_p3 = pnand %p2056_p1, %p2374_p8 }
  0x76   : > { %p2059_p11 = pneg %p2058_p3 }
  0x78   : > { %p2064_p13 = pnand %p2062_p12, %p2059_p11 }
  0x7a   : > { %2067 = shalt.err (!%p2064_p13)
}
  0x7b   : > { %s2068_s23 = scalar_lea.vmem %s328_s9, 512  ;;  %p2076_p7 = scmp.lt.s32.totalorder %s328_s9, %s328_s9 }
  0x7c   : > { %p2069_p0 = scmp.ne.s32.totalorder %s328_s9, %s2068_s23  ;;  %p2077_p9 = scmp.lt.s32.totalorder %s2068_s23, %s2068_s23 }
  0x7e   : > { %p2071_p2 = pnand %p2069_p0, %p2374_p8  ;;  %p2078_p5 = por %p2077_p9, %p2076_p7 }
  0x80   : > { %p2072_p4 = pneg %p2071_p2 }
  0x82   : > { %p2079_p10 = pnand %p2078_p5, %p2072_p4 }
  0x84   : > { %2082 = shalt.err (!%p2079_p10)
}
  0x85   : > { %1868 = dma.hbm_to_vmem [thread:$0]  (!%p2358_p6), %s2790_s5, 512, %s328_s9, [#allocation12], %s2246_s24, %s2246_s24, %s2247_s25  }
  0x86   : > { %s1648_s19 = sadd.s32 4294967294, %s2241_s14   ;;  %s42_s29 = sadd.s32 1, %s2237_s13 }
  0x87   : > { %p44_p8 = scmp.ge.s32.totalorder %s42_s29, 2  ;;  %s51_s8 = sadd.s32 1, %s2229_s11 }
  0x88   : > { %p58_p1 = scmp.ne.s32.totalorder %s2229_s11, %s2225_s10  ;;  %p59_p3 = scmp.eq.s32.totalorder %s2241_s14, 0 }
  0x89   : > { %s2819_s29 = smov (%p44_p8, %s42_s29), 0  ;;  %p64_p12 = scmp.ne.s32.totalorder %s2225_s10, %s2221_s30 }
  0x8a   : > { %2791 = sst [smem:[#allocation20_spill]] %s2819_s29  ;;  %p2475_p11 = por %p59_p3, %p58_p1 }
  0x8b   : > { %s46_s24 = ssub.s32 %s2237_s13, %s2819_s29  ;;  %p263_p6 = scmp.eq.s32.totalorder %s2342_s15, 1 }
  0x8c   : > { %p49_p13 = scmp.eq.s32.totalorder %s46_s24, 0  ;;  %p2793_p0 = scmp.eq.s32.totalorder %s2342_s15, 0 }
  0x8d   : > { %p2490_p4 = por %p263_p6, %p58_p1  ;;  %p269_p7 = scmp.eq.s32.totalorder %s1648_s19, 1 }
  0x8e   : > { %p2486_p2 = por %p2793_p0, %p64_p12  ;;  %p1884_p5 = scmp.lt.s32.totalorder %s2241_s14, 2 }
  0x8f   : > { %s2795_s9 = scalar_select %p2490_p4, 1, 0 }
  0x90   : > { %s2794_s25 = scalar_select %p2486_p2, 1, 0 }
  0x91   : > { %s2495_s27 = scalar_select %p49_p13, %s2229_s11, %s51_s8  }
  0x92   : > { %p2497_p9 = por %p269_p7, %p64_p12  ;;  %s350_s17 = sand.u32 1, %s2229_s11  }
  0x93   : > { %s1656_s20 = sshll.u32 %s2237_s13, 7  ;;  %s2504_s22 = sshll.u32 %s350_s17, 3 }
  0x94   : > { %s2796_s28 = scalar_select %p2497_p9, 1, 0 }
  0x95   : > { %s2509_s21 = scalar_lea.hbm %s2761_s0, %s1656_s20  ;;  %s354_s7 = scalar_lea.vmem [#allocation2], %s2504_s22 }
  0x96   : > { %s362_s19 = sshll.u32 %s354_s7, 4  ;;  %p2514_p10 = pnand %p1884_p5, %p2475_p11  ;;  %s2518_s19 = int_to_ptr.vmem [resolvable:$true] %s362_s19 }
  0x97   : > { %s2523_s23 = scalar_lea.hbm %s2762_s1, %s1656_s20  ;;  %s351_s2 = scalar_lea.sflag [#allocation3], %s350_s17 }
  0x98   : > { %s2083_s3 = scalar_lea.hbm %s2509_s21, 128  ;;  %p2085_p1 = pneg %p2514_p10 }
  0x99   : > { %p2084_p8 = scmp.ne.s32.totalorder %s2509_s21, %s2083_s3  ;;  %s2088_s4 = scalar_lea.hbm %s2761_s0, 256 }
  0x9a   : > { %p2089_p12 = scmp.lt.u32.totalorder %s2509_s21, %s2761_s0  ;;  %p2090_p6 = scmp.lt.u32.totalorder %s2088_s4, %s2083_s3 }
  0x9b   : > { %p2086_p3 = pnand %p2085_p1, %p2084_p8  ;;  %p2092_p0 = scmp.lt.u32.totalorder %s2083_s3, %s2509_s21 }
  0x9c   : > { %p2091_p13 = por %p2090_p6, %p2089_p12 }
  0x9d   : > { %p2087_p11 = pneg %p2086_p3 }
  0x9e   : > { %p2093_p7 = por %p2092_p0, %p2091_p13 }
  0xa0   : > { %p2094_p5 = pnand %p2093_p7, %p2087_p11 }
  0xa2   : > { %2097 = shalt.err (!%p2094_p5)
}
  0xa3   : > { %s2098_s17 = scalar_lea.vmem %s2518_s19, 128  ;;  %s2249_s20 = smov [#allocation2]  }
  0xa4   : > { %p2099_p8 = scmp.ne.s32.totalorder %s2518_s19, %s2098_s17  ;;  %s2103_s24 = sshll.u32 %s2249_s20, 4  ;;  %s2104_s24 = int_to_ptr.vmem [resolvable:$false] %s2103_s24 }
  0xa5   : > { %s2105_s5 = scalar_lea.vmem %s2104_s24, 256  ;;  %p2106_p4 = scmp.lt.s32.totalorder %s2518_s19, %s2104_s24 }
  0xa6   : > { %p2101_p3 = pnand %p2099_p8, %p2085_p1  ;;  %p2107_p12 = scmp.lt.s32.totalorder %s2105_s5, %s2098_s17 }
  0xa8   : > { %p2102_p9 = pneg %p2101_p3  ;;  %p2108_p6 = por %p2107_p12, %p2106_p4 }
  0xaa   : > { %p2109_p13 = pnand %p2108_p6, %p2102_p9 }
  0xac   : > { %2112 = shalt.err (!%p2109_p13)
}
  0xad   : > { %1872 = dma.hbm_to_vmem [thread:$0]  (!%p2514_p10), %s2509_s21, 128, %s2518_s19, %s351_s2  }
  0xae   : > { %s369_s3 = sand.u32 1, %s2241_s14   ;;  %s373_s4 = scalar_lea.vmem [#allocation5], %s2504_s22 }
  0xaf   : > { %s380_s29 = sshll.u32 %s373_s4, 4  ;;  %s370_s18 = scalar_lea.sflag [#allocation6], %s369_s3  ;;  %s381_s29 = int_to_ptr.vmem [resolvable:$true] %s380_s29 }
  0xb0   : > { %s2113_s26 = scalar_lea.hbm %s2523_s23, 128  ;;  %s2118_s20 = scalar_lea.hbm %s2762_s1, 256 }
  0xb1   : > { %p2114_p4 = scmp.ne.s32.totalorder %s2523_s23, %s2113_s26  ;;  %p2119_p0 = scmp.lt.u32.totalorder %s2523_s23, %s2762_s1 }
  0xb2   : > { %p2120_p7 = scmp.lt.u32.totalorder %s2118_s20, %s2113_s26  ;;  %p2122_p8 = scmp.lt.u32.totalorder %s2113_s26, %s2523_s23 }
  0xb3   : > { %p2116_p9 = pnand %p2114_p4, %p2085_p1 }
  0xb4   : > { %p2121_p5 = por %p2120_p7, %p2119_p0 }
  0xb5   : > { %p2117_p11 = pneg %p2116_p9 }
  0xb6   : > { %p2123_p3 = por %p2122_p8, %p2121_p5 }
  0xb8   : > { %p2124_p12 = pnand %p2123_p3, %p2117_p11 }
  0xba   : > { %2127 = shalt.err (!%p2124_p12)
}
  0xbb   : > { %s2128_s2 = scalar_lea.vmem %s381_s29, 128  ;;  %s2250_s22 = smov [#allocation5]  }
  0xbc   : > { %p2129_p6 = scmp.ne.s32.totalorder %s381_s29, %s2128_s2  ;;  %s2133_s21 = sshll.u32 %s2250_s22, 4  ;;  %s2134_s21 = int_to_ptr.vmem [resolvable:$false] %s2133_s21 }
  0xbd   : > { %s2135_s19 = scalar_lea.vmem %s2134_s21, 256  ;;  %p2136_p9 = scmp.lt.s32.totalorder %s381_s29, %s2134_s21 }
  0xbe   : > { %p2131_p13 = pnand %p2129_p6, %p2085_p1  ;;  %p2137_p2 = scmp.lt.s32.totalorder %s2135_s19, %s2128_s2 }
  0xc0   : > { %p2132_p4 = pneg %p2131_p13  ;;  %p2138_p0 = por %p2137_p2, %p2136_p9 }
  0xc2   : > { %p2139_p7 = pnand %p2138_p0, %p2132_p4 }
  0xc4   : > { %2142 = shalt.err (!%p2139_p7)
}
  0xc5   : > { %1875 = dma.hbm_to_vmem [thread:$0]  (!%p2514_p10), %s2523_s23, 128, %s381_s29, %s370_s18  }
  0xc6   : > { %p2798_p11 = scmp.ne.s32.totalorder %s2784_s16, 0 }
  0xc7   : > { %s2574_s3 = sand.u32 (!%p2798_p11), 1, %s2225_s10   ;;  %p2799_p2 = scmp.ne.s32.totalorder (!%p2798_p11), %s2794_s25, 0 }
  0xc8   : > { %389 = sbr.rel (%p2798_p11) target bundleno = 2443 (0x98b), region = 56  ;;  %s2577_s4 = sshll.u32 (!%p2798_p11), %s2574_s3, 3 }
  0xc9   : > { %s392_s26 = scalar_lea.sflag (!%p2798_p11), [#allocation3], %s2574_s3  ;;  %s395_s7 = scalar_lea.vmem (!%p2798_p11), [#allocation2], %s2577_s4 }
  0xcf   : > { %2196 = dma.done.wait (%p2799_p2), %s392_s26, 128  }
  0xd0   : > { %2198 = vsyncadd (%p2799_p2), %s392_s26, 4294967168  ;;  %s400_s16 = sand.u32 1, %s2342_s15   ;;  %s404_s23 = scalar_lea.vmem [#allocation5], %s2577_s4 }
  0xd1   : > { %s401_s8 = scalar_lea.sflag [#allocation6], %s400_s16 }
  0xd2   : > { %2200 = dma.done.wait (%p2799_p2), %s401_s8, 128  }
  0xd3   : > { %2202 = vsyncadd (%p2799_p2), %s401_s8, 4294967168  ;;  %p2800_p10 = scmp.eq.s32.totalorder %s2342_s15, 0 }
  0xd5   : > { %2204 = dma.done.wait (%p2800_p10), [#allocation6], 512   ;;  %p2801_p1 = pmov %p2800_p10 }
  0xd7   : > { %2206 = vsyncadd (%p2801_p1), [#allocation6], 4294966784  ;;  %p2802_p5 = pmov %p2801_p1 }
  0xd8   : > { %p2803_p8 = pmov %p2801_p1 }
  0xd9   : > { %2208 = dma.done.wait (%p2802_p5), [#allocation9], 1024  }
  0xda   : > { %2210 = vsyncadd (%p2803_p8), [#allocation9], 4294966272  ;;  %p2804_p3 = pmov %p2801_p1 }
  0xdb   : > { %p2805_p12 = pmov %p2801_p1 }
  0xdc   : > { %2212 = dma.done.wait (%p2804_p3), [#allocation12], 512  }
  0xdd   : > { %2214 = vsyncadd (%p2805_p12), [#allocation12], 4294966784  ;;  %v2251_v0 = vmov 0.0|0.0   ;;  %vm2252_vm0 = vmmov 0   ;;  %v2253_v1 = vmov 0.0   ;;  %v541_v2 = vld [vmem:[#allocation8] sm:$0xff]  ;;  %v693_v27 = vlaneseq }
  0xde   : > { %1816 = vmatprep.subr.bf16.mxu1 %v2251_v0  ;;  %1810 = vmatprep.subr.bf16.mxu0 %v2251_v0  ;;  %v542_v3 = vld [vmem:[#allocation8 + $0x8] sm:$0xff]  ;;  %v462_v4 = vld [vmem:[#allocation7] sm:$0xff]  ;;  %v543_v7 = vld [vmem:[#allocation8 + $0x10] sm:$0xff]  ;;  %vm466_vm1 = vcmask 261120   ;;  %vm701_vm2 = vcmask 64512   ;;  %s2254_s15 = smov 120  }
  0xdf   : > { %1745 = vmatprep.mubr.msk.f32.mxu1 %vm2252_vm0, %v2253_v1  ;;  %1734 = vmatprep.mubr.msk.f32.mxu0 %vm2252_vm0, %v2253_v1  ;;  %v1817_v5 = vpack.c.bf16 %v542_v3, %v541_v2  ;;  %v463_v6 = vld [vmem:[#allocation7 + $0x8] sm:$0xff]  ;;  %v544_v8 = vld [vmem:[#allocation8 + $0x18] sm:$0xff]  ;;  %v464_v10 = vld [vmem:[#allocation7 + $0x10] sm:$0xff]  ;;  %s2255_s25 = smov 112   ;;  %s2256_s29 = smov 104   ;;  %v694_v28 = vshrl.u32 %v693_v27, 7 }
  0xe0   : > { %v1811_v9 = vpack.c.bf16 %v463_v6, %v462_v4  ;;  %v465_v11 = vld [vmem:[#allocation7 + $0x18] sm:$0xff]  ;;  %v1820_v12 = vpack.c.bf16 %v544_v8, %v543_v7  ;;  %v2615_v15 = vld [vmem:[%s395_s7] sm:$0xff]  ;;  %v620_v23 = vld [vmem:[#allocation10 + $0x10] sm:$0xff]  ;;  %v698_v29 = vand.u32 127, %v693_v27  ;;  %s2257_s18 = smov 8   ;;  %s2258_s17 = smov 16  }
  0xe1   : > { %1818 = vmatpush3.bf16.msra.mxu1 %v1817_v5  ;;  %v1814_v13 = vpack.c.bf16 %v465_v11, %v464_v10  ;;  %v461_v14 = vld [vmem:[%s404_s23] sm:$0xff]  ;;  %v618_v21 = vld [vmem:[#allocation10] sm:$0xff]  ;;  %v619_v22 = vld [vmem:[#allocation10 + $0x8] sm:$0xff]  ;;  %s2259_s20 = smov 24   ;;  %vm1371_vm4 = vcmask 130048   ;;  %vm1373_vm5 = vcmask 195584  }
  0xe2   : > { %1812 = vmatpush3.bf16.msra.mxu0 %v1811_v9  ;;  %1819 = vmatprep.subr.bf16.mxu1 %v2251_v0  ;;  %v1823_v24 = vpack.c.bf16 %v619_v22, %v618_v21  ;;  %v621_v25 = vld [vmem:[#allocation10 + $0x18] sm:$0xff]  ;;  %vm699_vm3 = vcmp.gt.s32.totalorder %v698_v29, %v694_v28  ;;  %s2806_s21 = sld [smem:[#allocation25_spill]]  ;;  %s2807_s7 = sld [smem:[#allocation26_spill]] }
  0xe3   : > { %1813 = vmatprep.subr.bf16.mxu0 %v2251_v0  ;;  %v1826_v26 = vpack.c.bf16 %v621_v25, %v620_v23  ;;  %v700_v30 = vsel %vm699_vm3, -1e+30, %v2253_v1  ;;  %s1687_s16 = sshll.u32 %s2233_s12, 7  ;;  %s459_s8 = scalar_lea.vmem [#allocation13], %s2577_s4 }
  0xe4   : > { %s1506_s23 = sshll.u32 %s459_s8, 4  ;;  %p2809_p13 = scmp.ne.s32.totalorder %s2795_s9, 0  ;;  %s2713_s23 = int_to_ptr.vmem [resolvable:$true] %s1506_s23 }
  0xe5   : > { %1821 = vmatpush3.bf16.msra.mxu1 %v1820_v12  ;;  %s2260_s12 = smov [#allocation13]  }
  0xe6   : > { %1815 = vmatpush3.bf16.msra.mxu0 %v1814_v13  ;;  %1759 = vmatprep.subr.mxu1 %v2253_v1  ;;  %s2147_s4 = sshll.u32 %s2260_s12, 4  ;;  %s2148_s4 = int_to_ptr.vmem [resolvable:$false] %s2147_s4 }
  0xe7   : > { %1822 = vmatprep.subr.bf16.mxu0 %v2251_v0  ;;  %s2149_s24 = scalar_lea.vmem %s2148_s4, 256  ;;  %p2150_p0 = scmp.lt.s32.totalorder %s2713_s23, %s2148_s4 }
  0xe8   : > { %1746 = vmatmul.mubr.msk.f32.vlgmr.msra.gmra.mrb[0].mxu1 %vm466_vm1, %v461_v14 }
  0xe9   : > { %1735 = vmatmul.mubr.msk.f32.vlgmr.msra.gmra.mrb[0].mxu0 %vm466_vm1, %v2615_v15  ;;  %1761 = vmatprep.mubr.msk.f32.mxu1 %vm2252_vm0, %v2253_v1 }
  0xea   : > { %1756 = vmatprep.mubr.msk.f32.mxu0 %vm2252_vm0, %v2253_v1  ;;  %1824 = vmatpush3.bf16.msra.mxu0 %v1823_v24 }
  0xeb   : > { %1825 = vmatprep.subr.bf16.mxu0 %v2251_v0 }
  0xee   : > { %1827 = vmatpush3.bf16.msra.mxu0 %v1826_v26 }
  0xef   : > { %1779 = vmatprep.subr.mxu0 %v2253_v1 }
  0xf1   : > { %1757 = vmatmul.mubr.msk.f32.vlgmr.msra.gmra.mrb[2].mxu0 %vm466_vm1, %v461_v14 }
  0xf2   : > { %1781 = vmatprep.mubr.msk.f32.mxu0 %vm2252_vm0, %v2253_v1 }
 0x1bb   : > { %v614_v16 = vpop.f32.mrb[0].mxu1 }
 0x1bc   : > { %864 = vrot.lane.b32.xlu1 %v614_v16, %s2254_s15  ;;  %v536_v17 = vpop.f32.mrb[0].mxu0  ;;  %v1747_v18 = vpop.f32.mrb[1].mxu1  ;;  %1760 = vmatpush3.xpose.msk.msra.mxu1 %vm701_vm2, %v614_v16 }
 0x1bd   : > { %v540_v19 = vmul.f32 0.35355338, %v536_v17  ;;  %v1736_v20 = vpop.f32.mrb[1].mxu0  ;;  %1764 = vmatprep.subr.mxu1 %v2253_v1 }
 0x1bf   : > { %1762 = vmatmul.mubr.msk.f32.vlgmr.msra.gmra.mrb[2].mxu1 %vm701_vm2, %v540_v19 }
 0x1c0   : > { %862 = vrot.lane.b32.xlu1 %v540_v19, %s2254_s15  ;;  %1766 = vmatprep.mubr.msk.f32.mxu1 %vm2252_vm0, %v2253_v1 }
 0x1c4   : > { %1028 = vrot.lane.b32.xlu1 %v540_v19, %s2255_s25  ;;  %v2644_v40 = vpop.f32.mrb[2].mxu0 }
 0x1c5   : > { %v1758_v41 = vpop.f32.mrb[3].mxu0  ;;  %1765 = vmatpush3.msra.mxu1 %v2644_v40 }
 0x1c6   : > { %1769 = vmatprep.subr.mxu1 %v2253_v1 }
 0x1c8   : > { %1195 = vrot.lane.b32.xlu1 %v614_v16, %s2256_s29 }
 0x1cc   : > { %1193 = vrot.lane.b32.xlu1 %v540_v19, %s2256_s29 }
 0x22e   : > { %v865_v42 = vpop.permute.xlu1 %864 }
 0x232   : > { %v863_v43 = vpop.permute.xlu1 %862 }
 0x236   : > { %v1029_v44 = vpop.permute.xlu1 %1028 }
 0x23a   : > { %v1196_v47 = vpop.permute.xlu1 %1195 }
 0x23e   : > { %v1194_v49 = vpop.permute.xlu1 %1193 }
 0x292   : > { %v774_v31 = vpop.f32.mrb[2].mxu1 }
 0x293   : > { %v775_v32 = vadd.f32 %v774_v31, %v700_v30  ;;  %v1763_v33 = vpop.f32.mrb[3].mxu1  ;;  %v1375_v31 = vld [vmem:[#allocation11] sm:$0xff] }
 0x295   : > { %v778_v34 = vsel %vm701_vm2, %v775_v32, -inf }
 0x296   : > { %779 = vmax.xlane.f32.xlu0 %v778_v34  ;;  %v1377_v34 = vld [vmem:[#allocation11 + $0x10] sm:$0xff] }
 0x323   : > { %v780_v35 = vpop.xlane.xlu0 %779 }
 0x324   : > { %v781_v36 = vsub.f32 %v775_v32, %v780_v35  ;;  %v1376_v32 = vld [vmem:[#allocation11 + $0x8] sm:$0xff]  ;;  %v1378_v35 = vld [vmem:[#allocation11 + $0x18] sm:$0xff] }
 0x325   : > { %v1829_v33 = vpack.c.bf16 %v1376_v32, %v1375_v31 }
 0x326   : > { %v782_v37 = vmul.f32 1.442695, %v781_v36  ;;  %v1832_v36 = vpack.c.bf16 %v1378_v35, %v1377_v34 }
 0x328   : > { %1953 = vpow2.f32 %v782_v37 }
 0x332   : > { %v1954_v38 = vpop.eup %1953 }
 0x333   : > { %v784_v39 = vsel %vm701_vm2, %v1954_v38, 0.0 }
 0x334   : > { %785 = vadd.xlane.f32.xlu0 %v784_v39 }
 0x34a   : > { %1030 = vrot.lane.b32.xlu0 %v614_v16, %s2255_s25 }
 0x3c1   : > { %v786_v45 = vpop.xlane.xlu0 %785 }
 0x3c2   : > { %1955 = vrcp.f32 %v786_v45 }
 0x3c5   : > { %v1031_v46 = vpop.permute.xlu0 %1030 }
 0x3c6   : > { %1780 = vmatpush3.xpose.msk.msra.mxu0 %vm701_vm2, %v1031_v46 }
 0x3c7   : > { %1789 = vmatprep.subr.mxu0 %v2253_v1 }
 0x3c9   : > { %1782 = vmatmul.mubr.msk.f32.vlgmr.msra.gmra.mrb[4].mxu0 %vm701_vm2, %v1029_v44 }
 0x3ca   : > { %1790 = vmatpush3.xpose.msk.msra.mxu0 %vm701_vm2, %v1196_v47  ;;  %1791 = vmatprep.mubr.msk.f32.mxu0 %vm2252_vm0, %v2253_v1  ;;  %v1682_v47 = vld [vmem:[%s2767_s6] ss:$0 sm:$0xff] }
 0x3cb   : > { %1828 = vmatprep.subr.bf16.mxu0 %v2251_v0 }
 0x3cc   : > { %v1956_v48 = vpop.eup %1955 }
 0x3cd   : > { %v788_v50 = vmul.f32 %v1956_v48, %v1954_v38  ;;  %1792 = vmatmul.mubr.msk.f32.vlgmr.msra.gmra.mrb[6].mxu0 %vm701_vm2, %v1194_v49 }
 0x3ce   : > { %1807 = vmatprep.mubr.msk.f32.mxu0 %vm2252_vm0, %v2253_v1  ;;  %1830 = vmatpush3.bf16.msra.mxu0 %v1829_v33 }
 0x3cf   : > { %1767 = vmatmul.mubr.msk.f32.vlgmr.msra.gmra.mrb[4].mxu1 %vm701_vm2, %v788_v50  ;;  %1831 = vmatprep.subr.bf16.mxu0 %v2251_v0 }
 0x3d0   : > { %1770 = vmatpush3.xpose.msk.msra.mxu1 %vm701_vm2, %v865_v42  ;;  %1771 = vmatprep.mubr.msk.f32.mxu1 %vm2252_vm0, %v2253_v1 }
 0x3d1   : > { %1774 = vmatprep.subr.mxu1 %v2253_v1 }
 0x3d2   : > { %1833 = vmatpush3.bf16.msra.mxu0 %v1832_v36 }
 0x3d3   : > { %1772 = vmatmul.mubr.msk.f32.vlgmr.msra.gmra.mrb[6].mxu1 %vm701_vm2, %v863_v43 }
 0x3d4   : > { %1776 = vmatprep.mubr.msk.f32.mxu1 %vm2252_vm0, %v2253_v1 }
 0x49c   : > { %v1102_v51 = vpop.f32.mrb[4].mxu0 }
 0x49d   : > { %v1103_v52 = vadd.f32 %v1102_v51, %v700_v30  ;;  %v1783_v53 = vpop.f32.mrb[5].mxu0 }
 0x49f   : > { %v1106_v54 = vsel %vm701_vm2, %v1103_v52, -inf }
 0x4a0   : > { %1107 = vmax.xlane.f32.xlu0 %v1106_v54  ;;  %v1267_v55 = vpop.f32.mrb[6].mxu0 }
 0x4a1   : > { %v1793_v56 = vpop.f32.mrb[7].mxu0  ;;  %v1268_v62 = vadd.f32 %v1267_v55, %v700_v30 }
 0x4a2   : > { %v2668_v57 = vpop.f32.mrb[4].mxu1 }
 0x4a3   : > { %v1768_v58 = vpop.f32.mrb[5].mxu1  ;;  %v1271_v2 = vsel %vm701_vm2, %v1268_v62, -inf }
 0x4a6   : > { %v936_v59 = vpop.f32.mrb[6].mxu1 }
 0x4a7   : > { %v937_v60 = vadd.f32 %v936_v59, %v700_v30  ;;  %v1773_v61 = vpop.f32.mrb[7].mxu1 }
 0x4a9   : > { %v940_v63 = vsel %vm701_vm2, %v937_v60, -inf }
 0x4aa   : > { %941 = vmax.xlane.f32.xlu1 %v940_v63  ;;  %v1685_v63 = vld [vmem:[%s2807_s7] ss:$0 sm:$0xff] }
 0x4ae   : > { %1272 = vmax.xlane.f32.xlu1 %v1271_v2 }
 0x52d   : > { %v1108_v3 = vpop.xlane.xlu0 %1107 }
 0x52e   : > { %v1109_v4 = vsub.f32 %v1103_v52, %v1108_v3 }
 0x530   : > { %v1110_v5 = vmul.f32 1.442695, %v1109_v4 }
 0x532   : > { %1957 = vpow2.f32 %v1110_v5 }
 0x537   : > { %v942_v6 = vpop.xlane.xlu1 %941 }
 0x538   : > { %v943_v14 = vsub.f32 %v937_v60, %v942_v6 }
 0x53a   : > { %v944_v16 = vmul.f32 1.442695, %v943_v14 }
 0x53b   : > { %v1273_v7 = vpop.xlane.xlu1 %1272 }
 0x53c   : > { %v1958_v8 = vpop.eup %1957  ;;  %v1274_v9 = vsub.f32 %v1268_v62, %v1273_v7 }
 0x53d   : > { %v1112_v10 = vsel %vm701_vm2, %v1958_v8, 0.0 }
 0x53e   : > { %v1275_v11 = vmul.f32 1.442695, %v1274_v9  ;;  %1113 = vadd.xlane.f32.xlu0 %v1112_v10 }
 0x540   : > { %1959 = vpow2.f32 %v1275_v11 }
 0x541   : > { %1961 = vpow2.f32 %v944_v16 }
 0x54a   : > { %v1960_v12 = vpop.eup %1959 }
 0x54b   : > { %v1277_v13 = vsel %vm701_vm2, %v1960_v12, 0.0  ;;  %v1962_v17 = vpop.eup %1961 }
 0x54c   : > { %1278 = vadd.xlane.f32.xlu1 %v1277_v13  ;;  %v946_v18 = vsel %vm701_vm2, %v1962_v17, 0.0 }
 0x554   : > { %952 = vrot.lane.b32.xlu0 %v2644_v40, %s2254_s15 }
 0x55d   : > { %1117 = vrot.lane.b32.xlu1 %v2644_v40, %s2255_s25 }
 0x581   : > { %947 = vadd.xlane.f32.xlu1 %v946_v18 }
 0x592   : > { %1282 = vrot.lane.b32.xlu1 %v2644_v40, %s2256_s29  ;;  %s2808_s29 = sld [smem:[#allocation27_spill]] }
 0x5cb   : > { %v1114_v19 = vpop.xlane.xlu0 %1113 }
 0x5cf   : > { %v953_v20 = vpop.permute.xlu0 %952 }
 0x5d0   : > { %1775 = vmatpush3.msra.mxu1 %v953_v20 }
 0x5d1   : > { %1784 = vmatprep.subr.mxu1 %v2253_v1 }
 0x5d9   : > { %v1279_v21 = vpop.xlane.xlu1 %1278 }
 0x5dd   : > { %v1118_v22 = vpop.permute.xlu1 %1117 }
 0x60e   : > { %v948_v23 = vpop.xlane.xlu1 %947 }
 0x60f   : > { %1963 = vrcp.f32 %v948_v23 }
 0x610   : > { %1965 = vrcp.f32 %v1114_v19 }
 0x611   : > { %1967 = vrcp.f32 %v1279_v21 }
 0x612   : > { %v1283_v29 = vpop.permute.xlu1 %1282 }
 0x619   : > { %v1964_v24 = vpop.eup %1963 }
 0x61a   : > { %v950_v25 = vmul.f32 %v1964_v24, %v1962_v17  ;;  %v1966_v26 = vpop.eup %1965 }
 0x61b   : > { %v1116_v27 = vmul.f32 %v1966_v26, %v1958_v8  ;;  %v1968_v28 = vpop.eup %1967 }
 0x61c   : > { %1777 = vmatmul.mubr.msk.f32.vlgmr.msra.gmra.mrb[8].mxu1 %vm701_vm2, %v950_v25  ;;  %v1281_v30 = vmul.f32 %v1968_v28, %v1960_v12 }
 0x61d   : > { %1785 = vmatpush3.msra.mxu1 %v1118_v22  ;;  %1786 = vmatprep.mubr.msk.f32.mxu1 %vm2252_vm0, %v2253_v1 }
 0x61e   : > { %1794 = vmatprep.subr.mxu1 %v2253_v1 }
 0x620   : > { %1787 = vmatmul.mubr.msk.f32.vlgmr.msra.gmra.mrb[10].mxu1 %vm701_vm2, %v1116_v27 }
 0x621   : > { %1795 = vmatpush3.msra.mxu1 %v1283_v29  ;;  %1796 = vmatprep.mubr.msk.f32.mxu1 %vm2252_vm0, %v2253_v1 }
 0x624   : > { %1797 = vmatmul.mubr.msk.f32.vlgmr.msra.gmra.mrb[12].mxu1 %vm701_vm2, %v1281_v30 }
 0x6ef   : > { %v1024_v37 = vpop.f32.mrb[8].mxu1 }
 0x6f0   : > { %1359 = vrot.lane.b32.xlu0 %v1024_v37, %s2257_s18  ;;  %v1778_v38 = vpop.f32.mrb[9].mxu1  ;;  %s2711_s18 = scalar_lea.hbm %s2808_s29, %s1687_s16 }
 0x6f3   : > { %v1189_v39 = vpop.f32.mrb[10].mxu1 }
 0x6f4   : > { %1363 = vrot.lane.b32.xlu1 %v1189_v39, %s2258_s17  ;;  %v1788_v1 = vpop.f32.mrb[11].mxu1  ;;  %s1492_s17 = scalar_lea.sflag [#allocation4], %s2574_s3 }
 0x6f7   : > { %v1354_v40 = vpop.f32.mrb[12].mxu1 }
 0x6f8   : > { %1367 = vrot.lane.b32.xlu0 %v1354_v40, %s2259_s20  ;;  %v1798_v41 = vpop.f32.mrb[13].mxu1  ;;  %s2143_s20 = scalar_lea.vmem %s2713_s23, 128 }
 0x6f9   : > { %p2144_p6 = scmp.ne.s32.totalorder %s2713_s23, %s2143_s20  ;;  %p2151_p7 = scmp.lt.s32.totalorder %s2149_s24, %s2143_s20 }
 0x6fb   : > { %p2145_p4 = pnand %p2144_p6, %p2809_p13  ;;  %p2152_p11 = por %p2151_p7, %p2150_p0 }
 0x6fd   : > { %p2146_p9 = pneg %p2145_p4 }
 0x6ff   : > { %p2153_p2 = pnand %p2152_p11, %p2146_p9 }
 0x762   : > { %v1360_v42 = vpop.permute.xlu0 %1359 }
 0x763   : > { %v1370_v0 = vsel %vm701_vm2, %v2668_v57, %v1360_v42 }
 0x766   : > { %v1364_v43 = vpop.permute.xlu1 %1363 }
 0x767   : > { %v1372_v44 = vsel %vm1371_vm4, %v1370_v0, %v1364_v43 }
 0x76a   : > { %v1368_v45 = vpop.permute.xlu0 %1367 }
 0x76b   : > { %v1374_v46 = vsel %vm1373_vm5, %v1372_v44, %v1368_v45 }
 0x76c   : > { %1808 = vmatmul.mubr.msk.f32.vlgmr.msra.gmra.mrb[8].mxu0 %vm466_vm1, %v1374_v46 }
 0x83f   : > { %v1455_v48 = vpop.f32.mrb[8].mxu0 }
 0x840   : > { %v1456_v49 = vadd.f32 %v1682_v47, %v1455_v48  ;;  %v1809_v50 = vpop.f32.mrb[9].mxu0 }
 0x842   : > { %v1459_v51 = vadd.f32 %v1456_v49, %v2615_v15  ;;  %v1684_v15 = vld [vmem:[%s2806_s21] ss:$0 sm:$0xff] }
 0x844   : > { %v1460_v52 = vsel %vm466_vm1, %v1459_v51, 0.0 }
 0x845   : > { %1461 = vadd.xlane.f32.xlu1 %v1460_v52 }
 0x8d2   : > { %v1462_v53 = vpop.xlane.xlu1 %1461 }
 0x8d3   : > { %v1464_v54 = vmul.f32 0.03125, %v1462_v53 }
 0x8d5   : > { %v1465_v55 = vsub.f32 %v1459_v51, %v1464_v54 }
 0x8d7   : > { %v1466_v56 = vmul.f32 %v1465_v55, %v1465_v55 }
 0x8d9   : > { %v1467_v57 = vsel %vm466_vm1, %v1466_v56, 0.0 }
 0x8da   : > { %1468 = vadd.xlane.f32.xlu0 %v1467_v57 }
 0x967   : > { %v1469_v58 = vpop.xlane.xlu0 %1468 }
 0x968   : > { %v1470_v59 = vmul.f32 0.03125, %v1469_v58 }
 0x96a   : > { %v1471_v60 = vadd.f32 1e-05, %v1470_v59 }
 0x96c   : > { %1969 = vrsqrt.f32 %v1471_v60 }
 0x976   : > { %v1970_v61 = vpop.eup %1969 }
 0x977   : > { %v1473_v62 = vmul.f32 %v1970_v61, %v1465_v55 }
 0x979   : > { %v1481_v2 = vmul.f32 %v1684_v15, %v1473_v62 }
 0x97b   : > { %v1489_v3 = vadd.f32 %v1685_v63, %v1481_v2 }
 0x97d   : > { %1490 = vst.msk [vmem:[%s459_s8] sm:$0xff] %vm466_vm1, %v1489_v3 }
 0x97e   : > { %2156 = shalt.err (!%p2153_p2)
}
 0x97f   : > { %s2157_s3 = scalar_lea.hbm %s2711_s18, 128  ;;  %s2161_s22 = scalar_lea.hbm %s2808_s29, 256 }
 0x980   : > { %p2158_p10 = scmp.ne.s32.totalorder %s2711_s18, %s2157_s3  ;;  %p2162_p8 = scmp.lt.u32.totalorder %s2711_s18, %s2808_s29 }
 0x981   : > { %p2163_p3 = scmp.lt.u32.totalorder %s2161_s22, %s2157_s3  ;;  %p2165_p6 = scmp.lt.u32.totalorder %s2157_s3, %s2711_s18 }
 0x982   : > { %p2159_p1 = pnand %p2158_p10, %p2809_p13 }
 0x983   : > { %p2164_p12 = por %p2163_p3, %p2162_p8 }
 0x984   : > { %p2160_p5 = pneg %p2159_p1 }
 0x985   : > { %p2166_p4 = por %p2165_p6, %p2164_p12 }
 0x987   : > { %p2167_p9 = pnand %p2166_p4, %p2160_p5 }
 0x989   : > { %2170 = shalt.err (!%p2167_p9)
}
 0x98a   : > { %1854 = dma.vmem_to_hbm [thread:$0]  (%p2809_p13), %s2713_s23, 128, %s2711_s18, %s1492_s17  }
 0x98b PF: > { %s1518_s26 = sand.u32 1, %s2221_s30   ;;  %p2810_p0 = scmp.ne.s32.totalorder %s2796_s28, 0 }
 0x98c   : > { %p2811_p7 = scmp.ge.s32.totalorder %s2241_s14, 2  ;;  %s1519_s7 = scalar_lea.sflag [#allocation4], %s1518_s26 }
 0x98e   : > { %p1877_p11 = pnand %p2811_p7, %p2810_p0 }
 0x990   : > { %2216 = dma.done.wait (!%p1877_p11), %s1519_s7, 128  }
 0x991   : > { %2218 = vsyncadd (!%p1877_p11), %s1519_s7, 4294967168  ;;  %s30_s14 = sadd.s32 1, %s2241_s14   ;;  %s2812_s9 = sld [smem:[#allocation20_spill]] }
 0x992   : > { %p27_p2 = scmp.ge.s32.totalorder %s30_s14, 4   ;;  %s2813_s30 = smov %s2225_s10 }
 0x993   : > { %s2814_s10 = smov %s2229_s11  ;;  %s2815_s11 = smov %s2495_s27 }
 0x994   : > { %s2816_s12 = smov %s2237_s13  ;;  %29 = sbr.rel (!%p27_p2) target bundleno = 18 (0x12), region = 130 }
 0x997   : > { %s2817_s13 = smov %s2812_s9 }
 0x99b   :  { %1524 = vsyncpa [#allocation3], 1 }
 0x99c   :  { %1526 = vsyncpa [#allocation3 + $0x1], 1 }
 0x99d   :  { %1527 = vsyncpa [#allocation6], 1 }
 0x99e   :  { %1529 = vsyncpa [#allocation6 + $0x1], 1 }
 0x99f   :  { %1530 = vsyncpa [#allocation9], 1 }
 0x9a0   :  { %1531 = vsyncpa [#allocation12], 1 }
 0x9a1   :  { %1532 = vsyncpa [#allocation4], 1 }
 0x9a2   :  { %1534 = vsyncpa [#allocation4 + $0x1], 1 }

</bundles_post_ra>
